<compile_context>
chip_gen: v7x
topology: tpu7x:2x2x1
jax: 0.10.0
libtpu: 0.0.40
codegen_flags: <defaults>
</compile_context>

<pallas_src>
import functools

import jax
import jax.numpy as jnp
from jax import lax
from jax.experimental import pallas as pl
from jax.experimental.pallas import tpu as pltpu


_UNROLL_MAX_NC = 16  # unrolled recurrence below this; fori_loop recurrence above.


def _cumprod_sum(v, nc):
    """sum(cumprod(v)) for an (nc, 1) column vector -> (1, 1).

    Pure elementwise select + full sum-reduce recurrence: bulletproof Mosaic
    lowering, no transposes, no (nc, nc) materialization, layout-agnostic.
    """
    row = lax.broadcasted_iota(jnp.int32, v.shape, 0)  # (nc, 1)

    if nc <= _UNROLL_MAX_NC:
        running = jnp.ones((1, 1), jnp.float32)
        csum = jnp.zeros((1, 1), jnp.float32)
        for j in range(nc):
            vj = jnp.sum(jnp.where(row == j, v, jnp.float32(0.0)), keepdims=True)
            running = running * vj
            csum = csum + running
        return csum

    def body(j, carry):
        running, csum = carry
        vj = jnp.sum(jnp.where(row == j, v, jnp.float32(0.0)), keepdims=True)
        running = running * vj
        return running, csum + running

    _, csum = lax.fori_loop(
        0, nc, body,
        (jnp.ones((1, 1), jnp.float32), jnp.zeros((1, 1), jnp.float32)),
    )
    return csum


def _fxc2_kernel(x_ref, c_ref, out_ref, row_acc_ref, sq_acc_ref,
                 *, nc: int, d: int, tile_d: int):
    # x_ref  : (nc, tile_d) f32/bf16 block of x (d lane-major)
    # c_ref  : (nc, 1) f32
    # out_ref: (1, 1)  f32
    # row_acc_ref: (nc, 1) f32 scratch -- running sum over d of sigmoid(x)
    # sq_acc_ref : (1, 1)  f32 scratch -- running sum of x**2
    k = pl.program_id(0)

    @pl.when(k == 0)
    def _():
        row_acc_ref[...] = jnp.zeros_like(row_acc_ref)
        sq_acc_ref[...] = jnp.zeros_like(sq_acc_ref)

    x = x_ref[...].astype(jnp.float32)                   # upcast (bf16 storage ok)
    sig = 0.5 * (jnp.tanh(0.5 * x) + 1.0)                # sigmoid, single EUP op
    xsq = x * x

    if d % tile_d != 0:
        # Mask the padded tail of the last block.
        col = lax.broadcasted_iota(jnp.int32, (nc, tile_d), 1)
        valid = col < (d - k * tile_d)
        sig = jnp.where(valid, sig, jnp.float32(0.0))
        xsq = jnp.where(valid, xsq, jnp.float32(0.0))

    row_acc_ref[...] += jnp.sum(sig, axis=1, keepdims=True)   # (nc, 1) lane reduce
    sq_acc_ref[...] += jnp.sum(xsq, keepdims=True)            # (1, 1)

    @pl.when(k == pl.num_programs(0) - 1)
    def _():
        fx_row = row_acc_ref[...] * jnp.float32(1.0 / d)       # mean over d, (nc, 1)
        v = c_ref[...] * fx_row                                # (nc, 1)
        csum = _cumprod_sum(v, nc)                             # (1, 1)
        out_ref[...] = (jnp.float32(nc) - csum
                        + jnp.float32(1e-8) * sq_acc_ref[...])


@functools.partial(jax.jit, static_argnames=("tile_d",))
def fxc2_forward(c, x_param, *, tile_d=512):
    """JAX/Pallas equivalent of fxc2.forward(c). Returns (fx, fx).

    x_param may be f32 or bf16 storage; accumulation is always f32.
    """
    nc, d = x_param.shape

    # Tile the d (lane) axis; single full-width block for small d.
    if d <= tile_d:
        tile_d = d
    else:
        tile_d = max(128, (tile_d // 128) * 128)   # lane-aligned tiles
        if tile_d >= d:
            tile_d = d
    grid_d = pl.cdiv(d, tile_d)

    c2 = jnp.asarray(c, jnp.float32).reshape(nc, 1)

    cost = pl.CostEstimate(
        flops=6 * nc * d + 6 * nc,
        transcendentals=nc * d,
        bytes_accessed=x_param.size * x_param.dtype.itemsize + nc * 4 + 4,
    )

    out = pl.pallas_call(
        functools.partial(_fxc2_kernel, nc=nc, d=d, tile_d=tile_d),
        out_shape=jax.ShapeDtypeStruct((1, 1), jnp.float32),
        grid_spec=pltpu.PrefetchScalarGridSpec(
            num_scalar_prefetch=0,
            grid=(grid_d,),
            in_specs=[
                pl.BlockSpec((nc, tile_d), lambda k: (0, k)),   # x: stream over d
                pl.BlockSpec((nc, 1), lambda k: (0, 0)),        # c: resident
            ],
            out_specs=pl.BlockSpec((1, 1), lambda k: (0, 0)),
            scratch_shapes=[
                pltpu.VMEM((nc, 1), jnp.float32),   # sum_d sigmoid(x) per row
                pltpu.VMEM((1, 1), jnp.float32),    # sum x**2
            ],
        ),
        compiler_params=pltpu.CompilerParams(
            dimension_semantics=("arbitrary",),
        ),
        cost_estimate=cost,
    )(x_param, c2)

    fx = out[0, 0]
    # TODO(synk): the PyTorch module's `self.eval += 1` counter is a Python-side
    # training-state side effect with no influence on the output; not modeled.
    return fx, fx


def _fxc2_reference(c, x_param):
    nc = x_param.shape[0]
    fx_row = jnp.mean(jax.nn.sigmoid(x_param), axis=1)
    fx = nc - jnp.sum(jnp.cumprod(c * fx_row, axis=0))
    fx = fx + 1e-8 * jnp.sum(x_param ** 2)
    return fx


if __name__ == "__main__":
    key = jax.random.PRNGKey(0)
    k_p1, k_c1, k_p2, k_c2 = jax.random.split(key, 4)

    # --- Test 1: module defaults (nc=10, d=10), f32 storage, single block. ---
    nc, d = 10, 10
    x_param = jax.random.normal(k_p1, (nc, d), dtype=jnp.float32)
    c = jax.random.normal(k_c1, (nc,), dtype=jnp.float32)

    fx1, fx2 = fxc2_forward(c, x_param)
    jax.block_until_ready(fx1)
    jax.block_until_ready(fx2)

    ref = _fxc2_reference(c, x_param)
    assert jnp.allclose(fx1, ref, rtol=1e-5, atol=1e-5), (fx1, ref)
    assert jnp.allclose(fx2, ref, rtol=1e-5, atol=1e-5), (fx2, ref)

    # --- Test 2: larger nc/d, bf16 storage, multi-step d-grid accumulation,
    #             fori_loop cumprod path (nc > _UNROLL_MAX_NC). ---
    nc2, d2 = 20, 256
    x2 = jax.random.normal(k_p2, (nc2, d2), dtype=jnp.float32).astype(jnp.bfloat16)
    c2 = jax.random.normal(k_c2, (nc2,), dtype=jnp.float32)

    fx1b, _ = fxc2_forward(c2, x2, tile_d=128)
    jax.block_until_ready(fx1b)

    ref2 = _fxc2_reference(c2, x2.astype(jnp.float32))
    assert jnp.allclose(fx1b, ref2, rtol=1e-4, atol=1e-4), (fx1b, ref2)

    print("KERNEL_OK")
</pallas_src>

<mosaic_0001>
module attributes {stable_mosaic.version = 11 : i64} {
  func.func @_fxc2_kernel(%arg0: i32, %arg1: memref<10x10xf32, #tpu.memory_space<vmem>>, %arg2: memref<10x1xf32, #tpu.memory_space<vmem>>, %arg3: memref<1x1xf32, #tpu.memory_space<vmem>>, %arg4: memref<10x1xf32, #tpu.memory_space<vmem>>, %arg5: memref<1x1xf32, #tpu.memory_space<vmem>>) attributes {dimension_semantics = [#tpu.dimension_semantics<arbitrary>], iteration_bounds = array<i64: 1>, scalar_prefetch = 0 : i64, scratch_operands = 2 : i64, tpu.core_type = #tpu.core_type<tc>, window_params = [{transform_indices = @transform_0, window_bounds = array<i64: 10, 10>}, {pipeline_mode = #tpu.pipeline_mode<synchronous>, transform_indices = @transform_1, window_bounds = array<i64: 10, 1>}, {pipeline_mode = #tpu.pipeline_mode<synchronous>, transform_indices = @transform_2, window_bounds = array<i64: 1, 1>}]} {
    %c0_i32 = arith.constant 0 : i32
    %0 = arith.cmpi eq, %arg0, %c0_i32 : i32
    %1 = arith.extui %0 : i1 to i32
    %c0_i32_0 = arith.constant 0 : i32
    %2 = arith.cmpi ne, %1, %c0_i32_0 : i32
    scf.if %2 {
      %cst_16 = arith.constant 0.000000e+00 : f32
      %28 = vector.broadcast %cst_16 : f32 to vector<10x1xf32>
      %c0_17 = arith.constant 0 : index
      %c0_18 = arith.constant 0 : index
      %29 = vector.load %arg4[%c0_17, %c0_18] : memref<10x1xf32, #tpu.memory_space<vmem>>, vector<10x1xf32>
      tpu.vector_store %arg4[%c0_17, %c0_18], %28 {strides = array<i32>} : memref<10x1xf32, #tpu.memory_space<vmem>>, vector<10x1xf32>,
      %cst_19 = arith.constant 0.000000e+00 : f32
      %30 = vector.broadcast %cst_19 : f32 to vector<1x1xf32>
      %c0_20 = arith.constant 0 : index
      %c0_21 = arith.constant 0 : index
      %31 = vector.load %arg5[%c0_20, %c0_21] : memref<1x1xf32, #tpu.memory_space<vmem>>, vector<1x1xf32>
      tpu.vector_store %arg5[%c0_20, %c0_21], %30 {strides = array<i32>} : memref<1x1xf32, #tpu.memory_space<vmem>>, vector<1x1xf32>,
    } else {
    }
    %c0 = arith.constant 0 : index
    %c0_1 = arith.constant 0 : index
    %3 = vector.load %arg1[%c0, %c0_1] : memref<10x10xf32, #tpu.memory_space<vmem>>, vector<10x10xf32>
    %cst = arith.constant 5.000000e-01 : f32
    %4 = vector.broadcast %cst : f32 to vector<10x10xf32>
    %5 = arith.mulf %4, %3 : vector<10x10xf32>
    %6 = math.tanh %5 : vector<10x10xf32>
    %cst_2 = arith.constant 1.000000e+00 : f32
    %7 = vector.broadcast %cst_2 : f32 to vector<10x10xf32>
    %8 = arith.addf %6, %7 : vector<10x10xf32>
    %cst_3 = arith.constant 5.000000e-01 : f32
    %9 = vector.broadcast %cst_3 : f32 to vector<10x10xf32>
    %10 = arith.mulf %9, %8 : vector<10x10xf32>
    %11 = arith.mulf %3, %3 : vector<10x10xf32>
    %c0_4 = arith.constant 0 : index
    %c0_5 = arith.constant 0 : index
    %12 = vector.load %arg4[%c0_4, %c0_5] : memref<10x1xf32, #tpu.memory_space<vmem>>, vector<10x1xf32>
    %cst_6 = arith.constant dense<0.000000e+00> : vector<10xf32>
    %13 = vector.multi_reduction <add>, %10, %cst_6 [1] : vector<10x10xf32> to vector<10xf32>
    %14 = vector.shape_cast %13 : vector<10xf32> to vector<10x1xf32>
    %15 = arith.addf %12, %14 : vector<10x1xf32>
    %c0_7 = arith.constant 0 : index
    %c0_8 = arith.constant 0 : index
    %16 = vector.load %arg4[%c0_7, %c0_8] : memref<10x1xf32, #tpu.memory_space<vmem>>, vector<10x1xf32>
    tpu.vector_store %arg4[%c0_7, %c0_8], %15 {strides = array<i32>} : memref<10x1xf32, #tpu.memory_space<vmem>>, vector<10x1xf32>,
    %c0_9 = arith.constant 0 : index
    %c0_10 = arith.constant 0 : index
    %17 = vector.load %arg5[%c0_9, %c0_10] : memref<1x1xf32, #tpu.memory_space<vmem>>, vector<1x1xf32>
    %18 = vector.shape_cast %11 : vector<10x10xf32> to vector<1x10x10xf32>
    %cst_11 = arith.constant dense<0.000000e+00> : vector<1xf32>
    %19 = vector.multi_reduction <add>, %18, %cst_11 [1, 2] : vector<1x10x10xf32> to vector<1xf32>
    %20 = vector.shape_cast %19 : vector<1xf32> to vector<1x1x1xf32>
    %21 = vector.extract %20[0, 0, 0] : f32 from vector<1x1x1xf32>
    %22 = vector.broadcast %21 : f32 to vector<1x1xf32>
    %23 = arith.addf %17, %22 : vector<1x1xf32>
    %c0_12 = arith.constant 0 : index
    %c0_13 = arith.constant 0 : index
    %24 = vector.load %arg5[%c0_12, %c0_13] : memref<1x1xf32, #tpu.memory_space<vmem>>, vector<1x1xf32>
    tpu.vector_store %arg5[%c0_12, %c0_13], %23 {strides = array<i32>} : memref<1x1xf32, #tpu.memory_space<vmem>>, vector<1x1xf32>,
    %c0_i32_14 = arith.constant 0 : i32
    %25 = arith.cmpi eq, %arg0, %c0_i32_14 : i32
    %26 = arith.extui %25 : i1 to i32
    %c0_i32_15 = arith.constant 0 : i32
    %27 = arith.cmpi ne, %26, %c0_i32_15 : i32
    scf.if %27 {
      %c0_16 = arith.constant 0 : index
      %c0_17 = arith.constant 0 : index
      %28 = vector.load %arg4[%c0_16, %c0_17] : memref<10x1xf32, #tpu.memory_space<vmem>>, vector<10x1xf32>
      %cst_18 = arith.constant 1.000000e-01 : f32
      %29 = vector.broadcast %cst_18 : f32 to vector<10x1xf32>
      %30 = arith.mulf %28, %29 : vector<10x1xf32>
      %c0_19 = arith.constant 0 : index
      %c0_20 = arith.constant 0 : index
      %31 = vector.load %arg2[%c0_19, %c0_20] : memref<10x1xf32, #tpu.memory_space<vmem>>, vector<10x1xf32>
      %32 = arith.mulf %31, %30 : vector<10x1xf32>
      %33 = tpu.iota {dimensions = array<i32: 0>} : vector<10x1xi32>
      %cst_21 = arith.constant 1.000000e+00 : f32
      %34 = vector.broadcast %cst_21 : f32 to vector<1x1xf32>
      %cst_22 = arith.constant 0.000000e+00 : f32
      %35 = vector.broadcast %cst_22 : f32 to vector<1x1xf32>
      %c0_i32_23 = arith.constant 0 : i32
      %36 = vector.broadcast %c0_i32_23 : i32 to vector<10x1xi32>
      %37 = arith.cmpi eq, %33, %36 : vector<10x1xi32>
      %cst_24 = arith.constant 0.000000e+00 : f32
      %38 = vector.broadcast %cst_24 : f32 to vector<10x1xf32>
      %39 = arith.select %37, %32, %38 : vector<10x1xi1>, vector<10x1xf32>
      %40 = vector.shape_cast %39 : vector<10x1xf32> to vector<1x10x1xf32>
      %cst_25 = arith.constant dense<0.000000e+00> : vector<1xf32>
      %41 = vector.multi_reduction <add>, %40, %cst_25 [1, 2] : vector<1x10x1xf32> to vector<1xf32>
      %42 = vector.shape_cast %41 : vector<1xf32> to vector<1x1x1xf32>
      %43 = vector.extract %42[0, 0, 0] : f32 from vector<1x1x1xf32>
      %44 = vector.broadcast %43 : f32 to vector<1x1xf32>
      %45 = arith.mulf %34, %44 : vector<1x1xf32>
      %46 = arith.addf %35, %45 : vector<1x1xf32>
      %c1_i32 = arith.constant 1 : i32
      %47 = vector.broadcast %c1_i32 : i32 to vector<10x1xi32>
      %48 = arith.cmpi eq, %33, %47 : vector<10x1xi32>
      %cst_26 = arith.constant 0.000000e+00 : f32
      %49 = vector.broadcast %cst_26 : f32 to vector<10x1xf32>
      %50 = arith.select %48, %32, %49 : vector<10x1xi1>, vector<10x1xf32>
      %51 = vector.shape_cast %50 : vector<10x1xf32> to vector<1x10x1xf32>
      %cst_27 = arith.constant dense<0.000000e+00> : vector<1xf32>
      %52 = vector.multi_reduction <add>, %51, %cst_27 [1, 2] : vector<1x10x1xf32> to vector<1xf32>
      %53 = vector.shape_cast %52 : vector<1xf32> to vector<1x1x1xf32>
      %54 = vector.extract %53[0, 0, 0] : f32 from vector<1x1x1xf32>
      %55 = vector.broadcast %54 : f32 to vector<1x1xf32>
      %56 = arith.mulf %45, %55 : vector<1x1xf32>
      %57 = arith.addf %46, %56 : vector<1x1xf32>
      %c2_i32 = arith.constant 2 : i32
      %58 = vector.broadcast %c2_i32 : i32 to vector<10x1xi32>
      %59 = arith.cmpi eq, %33, %58 : vector<10x1xi32>
      %cst_28 = arith.constant 0.000000e+00 : f32
      %60 = vector.broadcast %cst_28 : f32 to vector<10x1xf32>
      %61 = arith.select %59, %32, %60 : vector<10x1xi1>, vector<10x1xf32>
      %62 = vector.shape_cast %61 : vector<10x1xf32> to vector<1x10x1xf32>
      %cst_29 = arith.constant dense<0.000000e+00> : vector<1xf32>
      %63 = vector.multi_reduction <add>, %62, %cst_29 [1, 2] : vector<1x10x1xf32> to vector<1xf32>
      %64 = vector.shape_cast %63 : vector<1xf32> to vector<1x1x1xf32>
      %65 = vector.extract %64[0, 0, 0] : f32 from vector<1x1x1xf32>
      %66 = vector.broadcast %65 : f32 to vector<1x1xf32>
      %67 = arith.mulf %56, %66 : vector<1x1xf32>
      %68 = arith.addf %57, %67 : vector<1x1xf32>
      %c3_i32 = arith.constant 3 : i32
      %69 = vector.broadcast %c3_i32 : i32 to vector<10x1xi32>
      %70 = arith.cmpi eq, %33, %69 : vector<10x1xi32>
      %cst_30 = arith.constant 0.000000e+00 : f32
      %71 = vector.broadcast %cst_30 : f32 to vector<10x1xf32>
      %72 = arith.select %70, %32, %71 : vector<10x1xi1>, vector<10x1xf32>
      %73 = vector.shape_cast %72 : vector<10x1xf32> to vector<1x10x1xf32>
      %cst_31 = arith.constant dense<0.000000e+00> : vector<1xf32>
      %74 = vector.multi_reduction <add>, %73, %cst_31 [1, 2] : vector<1x10x1xf32> to vector<1xf32>
      %75 = vector.shape_cast %74 : vector<1xf32> to vector<1x1x1xf32>
      %76 = vector.extract %75[0, 0, 0] : f32 from vector<1x1x1xf32>
      %77 = vector.broadcast %76 : f32 to vector<1x1xf32>
      %78 = arith.mulf %67, %77 : vector<1x1xf32>
      %79 = arith.addf %68, %78 : vector<1x1xf32>
      %c4_i32 = arith.constant 4 : i32
      %80 = vector.broadcast %c4_i32 : i32 to vector<10x1xi32>
      %81 = arith.cmpi eq, %33, %80 : vector<10x1xi32>
      %cst_32 = arith.constant 0.000000e+00 : f32
      %82 = vector.broadcast %cst_32 : f32 to vector<10x1xf32>
      %83 = arith.select %81, %32, %82 : vector<10x1xi1>, vector<10x1xf32>
      %84 = vector.shape_cast %83 : vector<10x1xf32> to vector<1x10x1xf32>
      %cst_33 = arith.constant dense<0.000000e+00> : vector<1xf32>
      %85 = vector.multi_reduction <add>, %84, %cst_33 [1, 2] : vector<1x10x1xf32> to vector<1xf32>
      %86 = vector.shape_cast %85 : vector<1xf32> to vector<1x1x1xf32>
      %87 = vector.extract %86[0, 0, 0] : f32 from vector<1x1x1xf32>
      %88 = vector.broadcast %87 : f32 to vector<1x1xf32>
      %89 = arith.mulf %78, %88 : vector<1x1xf32>
      %90 = arith.addf %79, %89 : vector<1x1xf32>
      %c5_i32 = arith.constant 5 : i32
      %91 = vector.broadcast %c5_i32 : i32 to vector<10x1xi32>
      %92 = arith.cmpi eq, %33, %91 : vector<10x1xi32>
      %cst_34 = arith.constant 0.000000e+00 : f32
      %93 = vector.broadcast %cst_34 : f32 to vector<10x1xf32>
      %94 = arith.select %92, %32, %93 : vector<10x1xi1>, vector<10x1xf32>
      %95 = vector.shape_cast %94 : vector<10x1xf32> to vector<1x10x1xf32>
      %cst_35 = arith.constant dense<0.000000e+00> : vector<1xf32>
      %96 = vector.multi_reduction <add>, %95, %cst_35 [1, 2] : vector<1x10x1xf32> to vector<1xf32>
      %97 = vector.shape_cast %96 : vector<1xf32> to vector<1x1x1xf32>
      %98 = vector.extract %97[0, 0, 0] : f32 from vector<1x1x1xf32>
      %99 = vector.broadcast %98 : f32 to vector<1x1xf32>
      %100 = arith.mulf %89, %99 : vector<1x1xf32>
      %101 = arith.addf %90, %100 : vector<1x1xf32>
      %c6_i32 = arith.constant 6 : i32
      %102 = vector.broadcast %c6_i32 : i32 to vector<10x1xi32>
      %103 = arith.cmpi eq, %33, %102 : vector<10x1xi32>
      %cst_36 = arith.constant 0.000000e+00 : f32
      %104 = vector.broadcast %cst_36 : f32 to vector<10x1xf32>
      %105 = arith.select %103, %32, %104 : vector<10x1xi1>, vector<10x1xf32>
      %106 = vector.shape_cast %105 : vector<10x1xf32> to vector<1x10x1xf32>
      %cst_37 = arith.constant dense<0.000000e+00> : vector<1xf32>
      %107 = vector.multi_reduction <add>, %106, %cst_37 [1, 2] : vector<1x10x1xf32> to vector<1xf32>
      %108 = vector.shape_cast %107 : vector<1xf32> to vector<1x1x1xf32>
      %109 = vector.extract %108[0, 0, 0] : f32 from vector<1x1x1xf32>
      %110 = vector.broadcast %109 : f32 to vector<1x1xf32>
      %111 = arith.mulf %100, %110 : vector<1x1xf32>
      %112 = arith.addf %101, %111 : vector<1x1xf32>
      %c7_i32 = arith.constant 7 : i32
      %113 = vector.broadcast %c7_i32 : i32 to vector<10x1xi32>
      %114 = arith.cmpi eq, %33, %113 : vector<10x1xi32>
      %cst_38 = arith.constant 0.000000e+00 : f32
      %115 = vector.broadcast %cst_38 : f32 to vector<10x1xf32>
      %116 = arith.select %114, %32, %115 : vector<10x1xi1>, vector<10x1xf32>
      %117 = vector.shape_cast %116 : vector<10x1xf32> to vector<1x10x1xf32>
      %cst_39 = arith.constant dense<0.000000e+00> : vector<1xf32>
      %118 = vector.multi_reduction <add>, %117, %cst_39 [1, 2] : vector<1x10x1xf32> to vector<1xf32>
      %119 = vector.shape_cast %118 : vector<1xf32> to vector<1x1x1xf32>
      %120 = vector.extract %119[0, 0, 0] : f32 from vector<1x1x1xf32>
      %121 = vector.broadcast %120 : f32 to vector<1x1xf32>
      %122 = arith.mulf %111, %121 : vector<1x1xf32>
      %123 = arith.addf %112, %122 : vector<1x1xf32>
      %c8_i32 = arith.constant 8 : i32
      %124 = vector.broadcast %c8_i32 : i32 to vector<10x1xi32>
      %125 = arith.cmpi eq, %33, %124 : vector<10x1xi32>
      %cst_40 = arith.constant 0.000000e+00 : f32
      %126 = vector.broadcast %cst_40 : f32 to vector<10x1xf32>
      %127 = arith.select %125, %32, %126 : vector<10x1xi1>, vector<10x1xf32>
      %128 = vector.shape_cast %127 : vector<10x1xf32> to vector<1x10x1xf32>
      %cst_41 = arith.constant dense<0.000000e+00> : vector<1xf32>
      %129 = vector.multi_reduction <add>, %128, %cst_41 [1, 2] : vector<1x10x1xf32> to vector<1xf32>
      %130 = vector.shape_cast %129 : vector<1xf32> to vector<1x1x1xf32>
      %131 = vector.extract %130[0, 0, 0] : f32 from vector<1x1x1xf32>
      %132 = vector.broadcast %131 : f32 to vector<1x1xf32>
      %133 = arith.mulf %122, %132 : vector<1x1xf32>
      %134 = arith.addf %123, %133 : vector<1x1xf32>
      %c9_i32 = arith.constant 9 : i32
      %135 = vector.broadcast %c9_i32 : i32 to vector<10x1xi32>
      %136 = arith.cmpi eq, %33, %135 : vector<10x1xi32>
      %cst_42 = arith.constant 0.000000e+00 : f32
      %137 = vector.broadcast %cst_42 : f32 to vector<10x1xf32>
      %138 = arith.select %136, %32, %137 : vector<10x1xi1>, vector<10x1xf32>
      %139 = vector.shape_cast %138 : vector<10x1xf32> to vector<1x10x1xf32>
      %cst_43 = arith.constant dense<0.000000e+00> : vector<1xf32>
      %140 = vector.multi_reduction <add>, %139, %cst_43 [1, 2] : vector<1x10x1xf32> to vector<1xf32>
      %141 = vector.shape_cast %140 : vector<1xf32> to vector<1x1x1xf32>
      %142 = vector.extract %141[0, 0, 0] : f32 from vector<1x1x1xf32>
      %143 = vector.broadcast %142 : f32 to vector<1x1xf32>
      %144 = arith.mulf %133, %143 : vector<1x1xf32>
      %145 = arith.addf %134, %144 : vector<1x1xf32>
      %cst_44 = arith.constant 1.000000e+01 : f32
      %146 = vector.broadcast %cst_44 : f32 to vector<1x1xf32>
      %147 = arith.subf %146, %145 : vector<1x1xf32>
      %c0_45 = arith.constant 0 : index
      %c0_46 = arith.constant 0 : index
      %148 = vector.load %arg5[%c0_45, %c0_46] : memref<1x1xf32, #tpu.memory_space<vmem>>, vector<1x1xf32>
      %cst_47 = arith.constant 9.99999993E-9 : f32
      %149 = vector.broadcast %cst_47 : f32 to vector<1x1xf32>
      %150 = arith.mulf %149, %148 : vector<1x1xf32>
      %151 = arith.addf %147, %150 : vector<1x1xf32>
      %c0_48 = arith.constant 0 : index
      %c0_49 = arith.constant 0 : index
      %152 = vector.load %arg3[%c0_48, %c0_49] : memref<1x1xf32, #tpu.memory_space<vmem>>, vector<1x1xf32>
      tpu.vector_store %arg3[%c0_48, %c0_49], %151 {strides = array<i32>} : memref<1x1xf32, #tpu.memory_space<vmem>>, vector<1x1xf32>,
    } else {
    }
    return
  }
  func.func @transform_0(%arg0: i32) -> (i32, i32) {
    %c0_i32 = arith.constant 0 : i32
    %c0_i32_0 = arith.constant 0 : i32
    return %c0_i32, %arg0 : i32, i32
  }
  func.func @transform_1(%arg0: i32) -> (i32, i32) {
    %c0_i32 = arith.constant 0 : i32
    %c0_i32_0 = arith.constant 0 : i32
    %c0_i32_1 = arith.constant 0 : i32
    return %c0_i32, %c0_i32_0 : i32, i32
  }
  func.func @transform_2(%arg0: i32) -> (i32, i32) {
    %c0_i32 = arith.constant 0 : i32
    %c0_i32_0 = arith.constant 0 : i32
    %c0_i32_1 = arith.constant 0 : i32
    return %c0_i32, %c0_i32_0 : i32, i32
  }
}

</mosaic_0001>

<bundles_post_ra>
// kernel: fxc2_forward.1
= control target key start
LH: loop header
LB: loop body
LE: loop exit
PB: predicated region body
PF: predicated region fallthrough
CT: control target
= control target key end

     0   :  { %s402_s0 = inlined_call_operand.vmem [shape: f32[10,10], index: 0, kind: input, shape index: {}]   ;;  %s403_s1 = inlined_call_operand.vmem [shape: f32[10,1], index: 1, kind: input, shape index: {}]   ;;  %s404_s2 = inlined_call_operand.hbm [shape: f32[1,1], index: 2, kind: output, shape index: {}]  }
   0x1   :  { %v22_v0 = vld [vmem:[%s402_s0] sm:$0xff]  ;;  %v23_v1 = vld [vmem:[%s402_s0 + $0x8] sm:$0x3] }
   0x2   :  { %v24_v2 = vmul.f32 0.5, %v22_v0  ;;  %v25_v3 = vmul.f32 0.5, %v23_v1 }
   0x3   :  { %7 = vsyncpa [#allocation5], 0  ;;  %vm36_vm0 = vcmask 80896   ;;  %vm40_vm1 = vcmask 74752   ;;  %vm16_vm2 = vcmask 7168   ;;  %v341_v12 = vmov 0.0  }
   0x4   :  { %313 = vtanh.f32 %v24_v2  ;;  %17 = vst.msk [vmem:[#allocation2] sm:$0xff] %vm16_vm2, %v341_v12  ;;  %v32_v13 = vmul.f32 %v22_v0, %v22_v0  ;;  %v33_v14 = vmul.f32 %v23_v1, %v23_v1  ;;  %vm18_vm3 = vcmask 1024   ;;  %v74_v27 = vld [vmem:[%s403_s1] sm:$0xff]  ;;  %v75_v40 = vld [vmem:[%s403_s1 + $0x8] sm:$0x3]  ;;  %s342_s26 = smov [#allocation4]  }
   0x5   :  { %315 = vtanh.f32 %v25_v3  ;;  %19 = vst.msk [vmem:[#allocation2 + $0x8] sm:$0x3] %vm18_vm3, %v341_v12  ;;  %v78_v23 = vlaneseq  ;;  %vm20_vm14 = vcmask 0   ;;  %s281_s27 = sshll.u32 %s342_s26, 4  ;;  %s282_s27 = int_to_ptr.vmem [resolvable:$true] %s281_s27 }
   0x6   :  { %v51_v15 = vsel %vm36_vm0, %v32_v13, 0.0  ;;  %v52_v16 = vsel %vm40_vm1, %v33_v14, 0.0  ;;  %21 = vst.msk [vmem:[#allocation3] sm:$0x1] %vm20_vm14, %v341_v12  ;;  %s317_s28 = scalar_lea.vmem %s282_s27, 16  ;;  %s321_s29 = scalar_lea.vmem %s282_s27, 32 }
   0x7   :  { %v53_v17 = vadd.f32 %v52_v16, %v51_v15  ;;  %v79_v25 = vshrl.u32 %v78_v23, 7  ;;  %p318_p0 = scmp.ne.s32.totalorder %s282_s27, %s317_s28  ;;  %p322_p1 = scmp.lt.s32.totalorder %s282_s27, %s282_s27 }
   0x8   :  { %p323_p2 = scmp.lt.s32.totalorder %s321_s29, %s317_s28 }
   0x9   :  { %54 = vadd.xlane.f32.xlu1 %v53_v17  ;;  %vm99_vm4 = vcmp.eq.s32.totalorder %v79_v25, 1  ;;  %vm81_vm5 = vcmp.eq.s32.totalorder %v79_v25, 0  ;;  %vm137_vm6 = vcmp.eq.s32.totalorder %v79_v25, 3  ;;  %vm118_vm7 = vcmp.eq.s32.totalorder %v79_v25, 2 }
   0xa   :  { %vm175_vm8 = vcmp.eq.s32.totalorder %v79_v25, 5  ;;  %vm156_vm9 = vcmp.eq.s32.totalorder %v79_v25, 4  ;;  %v80_v41 = vadd.s32 8, %v79_v25  ;;  %vm213_vm10 = vcmp.eq.s32.totalorder %v79_v25, 7  ;;  %p324_p3 = por %p323_p2, %p322_p1 }
   0xb   :  { %v34_v18 = vld [vmem:[#allocation2] sm:$0xff]  ;;  %vm194_vm11 = vcmp.eq.s32.totalorder %v79_v25, 6 }
   0xc   :  { %v35_v21 = vld [vmem:[#allocation2 + $0x8] sm:$0x3]  ;;  %vm252_vm12 = vcmp.eq.s32.totalorder %v80_v41, 9  ;;  %vm233_vm13 = vcmp.eq.s32.totalorder %v80_v41, 8  ;;  %p325_p4 = pnand %p324_p3, %p318_p0 }
   0xd   :  { %v50_v62 = vld [vmem:[#allocation3] sm:$0x1] }
   0xe   :  { %v314_v4 = vpop.eup %313 }
   0xf   :  { %v316_v5 = vpop.eup %315  ;;  %v28_v6 = vadd.f32 1.0, %v314_v4 }
  0x10   :  { %v29_v7 = vadd.f32 1.0, %v316_v5 }
  0x11   :  { %v30_v8 = vmul.f32 0.5, %v28_v6 }
  0x12   :  { %v31_v9 = vmul.f32 0.5, %v29_v7 }
  0x13   :  { %v37_v10 = vsel %vm36_vm0, %v30_v8, 0.0 }
  0x14   :  { %38 = vadd.xlane.f32.xlu0 %v37_v10  ;;  %v41_v11 = vsel %vm40_vm1, %v31_v9, 0.0 }
  0x18   :  { %42 = vadd.xlane.f32.xlu0 %v41_v11 }
  0x96   :  { %v55_v42 = vpop.xlane.xlu1 %54 }
  0x97   :  { %v56_v45 = vrot.slane %v55_v42, 4 }
  0x99   :  { %v57_v47 = vadd.f32 %v56_v45, %v55_v42 }
  0x9b   :  { %v58_v52 = vrot.slane %v57_v47, 2 }
  0x9d   :  { %v59_v57 = vadd.f32 %v58_v52, %v57_v47 }
  0x9f   :  { %v60_v60 = vrot.slane %v59_v57, 1 }
  0xa1   :  { %v39_v19 = vpop.xlane.xlu0 %38  ;;  %v61_v61 = vadd.f32 %v60_v60, %v59_v57 }
  0xa2   :  { %v44_v20 = vadd.f32 %v39_v19, %v34_v18 }
  0xa3   :  { %289 = vpush %v61_v61 }
  0xa4   :  { %47 = vst.msk [vmem:[#allocation2] sm:$0xff] %vm16_vm2, %v44_v20 }
  0xa5   :  { %v43_v22 = vpop.xlane.xlu0 %42 }
  0xa6   :  { %v45_v24 = vadd.f32 %v43_v22, %v35_v21 }
  0xa8   :  { %49 = vst.msk [vmem:[#allocation2 + $0x8] sm:$0x3] %vm18_vm3, %v45_v24 }
  0xab   :  { %v70_v26 = vld [vmem:[#allocation2] sm:$0xff] }
  0xac   :  { %v72_v28 = vmul.f32 0.1, %v70_v26 }
  0xae   :  { %v76_v29 = vmul.f32 %v74_v27, %v72_v28 }
  0xaf   :  { %v71_v34 = vld [vmem:[#allocation2 + $0x8] sm:$0x3] }
  0xb0   :  { %v101_v30 = vsel %vm99_vm4, %v76_v29, 0.0  ;;  %v83_v31 = vsel %vm81_vm5, %v76_v29, 0.0  ;;  %v139_v35 = vsel %vm137_vm6, %v76_v29, 0.0  ;;  %v120_v36 = vsel %vm118_vm7, %v76_v29, 0.0 }
  0xb1   :  { %v103_v32 = vsel %vm16_vm2, %v101_v30, 0.0  ;;  %v85_v33 = vsel %vm16_vm2, %v83_v31, 0.0  ;;  %v73_v37 = vmul.f32 0.1, %v71_v34  ;;  %v141_v38 = vsel %vm16_vm2, %v139_v35, 0.0 }
  0xb2   :  { %106 = vadd.xlane.f32.xlu0 %v103_v32  ;;  %88 = vadd.xlane.f32.xlu1 %v85_v33  ;;  %v122_v39 = vsel %vm16_vm2, %v120_v36, 0.0  ;;  %v177_v43 = vsel %vm175_vm8, %v76_v29, 0.0  ;;  %v158_v44 = vsel %vm156_vm9, %v76_v29, 0.0  ;;  %v215_v50 = vsel %vm213_vm10, %v76_v29, 0.0 }
  0xb3   :  { %v77_v46 = vmul.f32 %v75_v40, %v73_v37  ;;  %v179_v48 = vsel %vm16_vm2, %v177_v43, 0.0  ;;  %v160_v49 = vsel %vm16_vm2, %v158_v44, 0.0  ;;  %v196_v51 = vsel %vm194_vm11, %v76_v29, 0.0 }
  0xb4   :  { %v217_v55 = vsel %vm16_vm2, %v215_v50, 0.0  ;;  %v198_v56 = vsel %vm16_vm2, %v196_v51, 0.0 }
  0xb5   :  { %v254_v53 = vsel %vm252_vm12, %v77_v46, 0.0  ;;  %v235_v54 = vsel %vm233_vm13, %v77_v46, 0.0 }
  0xb6   :  { %144 = vadd.xlane.f32.xlu0 %v141_v38  ;;  %125 = vadd.xlane.f32.xlu1 %v122_v39  ;;  %v256_v58 = vsel %vm18_vm3, %v254_v53, 0.0  ;;  %v237_v59 = vsel %vm18_vm3, %v235_v54, 0.0 }
  0xba   :  { %182 = vadd.xlane.f32.xlu0 %v179_v48  ;;  %163 = vadd.xlane.f32.xlu1 %v160_v49 }
  0xbe   :  { %220 = vadd.xlane.f32.xlu0 %v217_v55  ;;  %201 = vadd.xlane.f32.xlu1 %v198_v56 }
  0xc2   :  { %258 = vadd.xlane.f32.xlu0 %v256_v58  ;;  %239 = vadd.xlane.f32.xlu1 %v237_v59 }
  0xd4   :  { %s290_s1 = spop %289 }
  0xd5   :  { %v63_v63 = vstv %s290_s1 }
  0xd6   :  { %v64_v0 = vadd.f32 %v63_v63, %v50_v62 }
  0xd8   :  { %66 = vst.msk [vmem:[#allocation3] sm:$0x1] %vm20_vm14, %v64_v0 }
 0x13f   :  { %v107_v1 = vpop.xlane.xlu0 %106  ;;  %v89_v2 = vpop.xlane.xlu1 %88 }
 0x140   :  { %v108_v3 = vrot.slane %v107_v1, 4  ;;  %v90_v4 = vrot.slane %v89_v2, 4 }
 0x142   :  { %v109_v5 = vadd.f32 %v108_v3, %v107_v1  ;;  %v91_v6 = vadd.f32 %v90_v4, %v89_v2 }
 0x143   :  { %v145_v7 = vpop.xlane.xlu0 %144  ;;  %v126_v8 = vpop.xlane.xlu1 %125 }
 0x144   :  { %v110_v9 = vrot.slane %v109_v5, 2  ;;  %v92_v10 = vrot.slane %v91_v6, 2  ;;  %v146_v11 = vrot.slane %v145_v7, 4  ;;  %v127_v13 = vrot.slane %v126_v8, 4 }
 0x146   :  { %v147_v14 = vadd.f32 %v146_v11, %v145_v7  ;;  %v128_v12 = vadd.f32 %v127_v13, %v126_v8  ;;  %v93_v15 = vadd.f32 %v92_v10, %v91_v6  ;;  %v111_v16 = vadd.f32 %v110_v9, %v109_v5 }
 0x147   :  { %v183_v17 = vpop.xlane.xlu0 %182  ;;  %v164_v18 = vpop.xlane.xlu1 %163 }
 0x148   :  { %v148_v19 = vrot.slane %v147_v14, 2  ;;  %v129_v20 = vrot.slane %v128_v12, 2  ;;  %v184_v21 = vrot.slane %v183_v17, 4  ;;  %v165_v22 = vrot.slane %v164_v18, 4 }
 0x149   :  { %v94_v23 = vrot.slane %v93_v15, 1  ;;  %v112_v24 = vrot.slane %v111_v16, 1 }
 0x14a   :  { %v185_v25 = vadd.f32 %v184_v21, %v183_v17  ;;  %v166_v26 = vadd.f32 %v165_v22, %v164_v18  ;;  %v130_v27 = vadd.f32 %v129_v20, %v128_v12  ;;  %v149_v28 = vadd.f32 %v148_v19, %v147_v14 }
 0x14b   :  { %v221_v29 = vpop.xlane.xlu0 %220  ;;  %v202_v30 = vpop.xlane.xlu1 %201  ;;  %v95_v31 = vadd.f32 %v94_v23, %v93_v15  ;;  %v113_v32 = vadd.f32 %v112_v24, %v111_v16 }
 0x14c   :  { %v186_v33 = vrot.slane %v185_v25, 2  ;;  %v167_v34 = vrot.slane %v166_v26, 2  ;;  %v222_v35 = vrot.slane %v221_v29, 4  ;;  %v203_v36 = vrot.slane %v202_v30, 4 }
 0x14d   :  { %291 = vpush %v95_v31  ;;  %v131_v37 = vrot.slane %v130_v27, 1  ;;  %v150_v38 = vrot.slane %v149_v28, 1 }
 0x14e   :  { %v223_v39 = vadd.f32 %v222_v35, %v221_v29  ;;  %v204_v40 = vadd.f32 %v203_v36, %v202_v30  ;;  %293 = vpush %v113_v32  ;;  %v168_v41 = vadd.f32 %v167_v34, %v166_v26  ;;  %v187_v42 = vadd.f32 %v186_v33, %v185_v25  ;;  %v271_v34 = vld [vmem:[#allocation3] sm:$0x1] }
 0x14f   :  { %v259_v43 = vpop.xlane.xlu0 %258  ;;  %v240_v44 = vpop.xlane.xlu1 %239  ;;  %v132_v45 = vadd.f32 %v131_v37, %v130_v27  ;;  %v151_v46 = vadd.f32 %v150_v38, %v149_v28  ;;  %v272_v37 = vmul.f32 1e-08, %v271_v34 }
 0x150   :  { %v224_v47 = vrot.slane %v223_v39, 2  ;;  %v205_v48 = vrot.slane %v204_v40, 2  ;;  %v260_v49 = vrot.slane %v259_v43, 4  ;;  %v241_v50 = vrot.slane %v240_v44, 4 }
 0x151   :  { %295 = vpush %v132_v45  ;;  %v169_v51 = vrot.slane %v168_v41, 1  ;;  %v188_v52 = vrot.slane %v187_v42, 1 }
 0x152   :  { %v261_v53 = vadd.f32 %v260_v49, %v259_v43  ;;  %v242_v54 = vadd.f32 %v241_v50, %v240_v44  ;;  %297 = vpush %v151_v46  ;;  %v206_v55 = vadd.f32 %v205_v48, %v204_v40  ;;  %v225_v56 = vadd.f32 %v224_v47, %v223_v39 }
 0x153   :  { %v170_v57 = vadd.f32 %v169_v51, %v168_v41  ;;  %v189_v58 = vadd.f32 %v188_v52, %v187_v42 }
 0x154   :  { %v262_v59 = vrot.slane %v261_v53, 2  ;;  %v243_v60 = vrot.slane %v242_v54, 2  ;;  %v207_v61 = vrot.slane %v206_v55, 1  ;;  %v226_v62 = vrot.slane %v225_v56, 1 }
 0x155   :  { %299 = vpush %v170_v57 }
 0x156   :  { %v263_v63 = vadd.f32 %v262_v59, %v261_v53  ;;  %v244_v0 = vadd.f32 %v243_v60, %v242_v54  ;;  %301 = vpush %v189_v58  ;;  %v208_v1 = vadd.f32 %v207_v61, %v206_v55  ;;  %v227_v2 = vadd.f32 %v226_v62, %v225_v56 }
 0x158   :  { %303 = vpush %v208_v1  ;;  %v245_v3 = vrot.slane %v244_v0, 1  ;;  %v264_v4 = vrot.slane %v263_v63, 1 }
 0x159   :  { %305 = vpush %v227_v2 }
 0x15a   :  { %v246_v5 = vadd.f32 %v245_v3, %v244_v0  ;;  %v265_v6 = vadd.f32 %v264_v4, %v263_v63 }
 0x15c   :  { %307 = vpush %v246_v5 }
 0x15d   :  { %309 = vpush %v265_v6 }
 0x17e   :  { %s292_s16 = spop %291 }
 0x17f   :  { %v97_v7 = vstv %s292_s16  ;;  %s294_s17 = spop %293 }
 0x180   :  { %v115_v8 = vstv %s294_s17 }
 0x181   :  { %v116_v9 = vmul.f32 %v115_v8, %v97_v7 }
 0x182   :  { %s296_s18 = spop %295 }
 0x183   :  { %v134_v10 = vstv %s296_s18  ;;  %s298_s19 = spop %297  ;;  %v117_v11 = vadd.f32 %v116_v9, %v97_v7 }
 0x184   :  { %v135_v13 = vmul.f32 %v134_v10, %v116_v9  ;;  %v153_v14 = vstv %s298_s19 }
 0x186   :  { %v136_v12 = vadd.f32 %v135_v13, %v117_v11  ;;  %v154_v15 = vmul.f32 %v153_v14, %v135_v13  ;;  %s300_s20 = spop %299 }
 0x187   :  { %v172_v16 = vstv %s300_s20  ;;  %s302_s21 = spop %301 }
 0x188   :  { %v155_v17 = vadd.f32 %v154_v15, %v136_v12  ;;  %v173_v18 = vmul.f32 %v172_v16, %v154_v15  ;;  %v191_v19 = vstv %s302_s21 }
 0x189   :  { %s304_s22 = spop %303 }
 0x18a   :  { %v174_v20 = vadd.f32 %v173_v18, %v155_v17  ;;  %v192_v21 = vmul.f32 %v191_v19, %v173_v18  ;;  %v210_v22 = vstv %s304_s22  ;;  %s306_s23 = spop %305 }
 0x18b   :  { %v229_v25 = vstv %s306_s23 }
 0x18c   :  { %v193_v23 = vadd.f32 %v192_v21, %v174_v20  ;;  %v211_v24 = vmul.f32 %v210_v22, %v192_v21 }
 0x18d   :  { %s308_s24 = spop %307 }
 0x18e   :  { %v212_v26 = vadd.f32 %v211_v24, %v193_v23  ;;  %v230_v27 = vmul.f32 %v229_v25, %v211_v24  ;;  %v248_v28 = vstv %s308_s24  ;;  %s310_s25 = spop %309 }
 0x18f   :  { %v267_v31 = vstv %s310_s25 }
 0x190   :  { %v231_v29 = vadd.f32 %v230_v27, %v212_v26  ;;  %v249_v30 = vmul.f32 %v248_v28, %v230_v27 }
 0x192   :  { %v250_v32 = vadd.f32 %v249_v30, %v231_v29  ;;  %v268_v33 = vmul.f32 %v267_v31, %v249_v30 }
 0x194   :  { %v269_v35 = vadd.f32 %v268_v33, %v250_v32 }
 0x196   :  { %v270_v36 = vsub.f32 10.0, %v269_v35 }
 0x198   :  { %v273_v38 = vadd.f32 %v272_v37, %v270_v36 }
 0x19a   :  { %274 = vst.msk [vmem:[#allocation4] sm:$0x1] %vm20_vm14, %v273_v38 }
 0x19b   :  { %328 = shalt.err (!%p325_p4)
}
 0x19c   :  { %s329_s4 = scalar_lea.hbm %s404_s2, 16 }
 0x19d   :  { %p330_p5 = scmp.ne.s32.totalorder %s404_s2, %s329_s4  ;;  %p333_p6 = scmp.lt.u32.totalorder %s329_s4, %s404_s2 }
 0x19f   :  { %p335_p7 = pnand %p333_p6, %p330_p5 }
 0x1a1   :  { %338 = shalt.err (!%p335_p7)
}
 0x1a2   :  { %284 = dma.vmem_to_hbm [thread:$0]  %s282_s27, 16, %s404_s2, [#allocation5]  }
 0x1a3   :  { %339 = dma.done.wait [#allocation5], 16  }
 0x1a4   :  { %340 = vsyncadd [#allocation5], 4294967280 }
 0x1a5   :  { %288 = vsyncpa [#allocation5], 1 }

</bundles_post_ra>
